<compile_context>
chip_gen: v7x
topology: tpu7x:2x2x1
jax: 0.10.0
libtpu: 0.0.40
codegen_flags: <defaults>
</compile_context>

<pallas_src>
import functools

import jax
import jax.numpy as jnp
from jax.experimental import pallas as pl
from jax.experimental.pallas import tpu as pltpu

EPS = 1e-5

_ROLL_SIGN = None


def _lane_roll_sign():
    """Empirically pins pltpu.roll's rotation direction with one tiny probe.

    Returns +1 if pltpu.roll matches jnp.roll (element i moves to i+shift),
    -1 if it rotates the other way, so the conv-tap construction below stays
    correct regardless of the Mosaic rotate convention.
    """
    global _ROLL_SIGN
    if _ROLL_SIGN is None:
        def probe(x_ref, o_ref):
            o_ref[...] = pltpu.roll(x_ref[...], 1, axis=1)

        x = jnp.broadcast_to(jnp.arange(128, dtype=jnp.float32), (8, 128))
        y = pl.pallas_call(
            probe, out_shape=jax.ShapeDtypeStruct((8, 128), jnp.float32))(x)
        v = float(y[0, 0])
        if v == 127.0:
            _ROLL_SIGN = 1          # jnp.roll convention
        elif v == 1.0:
            _ROLL_SIGN = -1         # opposite convention
        else:
            raise RuntimeError(f"unexpected pltpu.roll behaviour (got {v})")
    return _ROLL_SIGN


# ----------------------------------------------------------------------------
# Fused extractor kernel: stem + 3 BasicBlocks, one (or B) image(s) per step.
# Activations are channel-major (C, H*W) f32; conv inputs are rounded to bf16
# exactly where the reference rounds them.
# ----------------------------------------------------------------------------
def _extractor_kernel(x_ref, ws_ref, wb_ref, scale_ref, bias_ref, o_ref,
                      col_ref, act_ref, *, H, W, C, B, roll_sign):
    HW = H * W

    # Tap-validity masks along the flattened spatial (lane) axis; computed once.
    opos = jax.lax.broadcasted_iota(jnp.int32, (1, HW), 1)
    wpos = opos % W
    m_top = (opos >= W).astype(jnp.float32)         # tap dh == 0 needs h-1 >= 0
    m_bot = (opos < HW - W).astype(jnp.float32)     # tap dh == 2 needs h+1 <  H
    m_lft = (wpos >= 1).astype(jnp.float32)         # tap dw == 0 needs w-1 >= 0
    m_rgt = (wpos <= W - 2).astype(jnp.float32)     # tap dw == 2 needs w+1 <  W

    def shifted(src, d):
        # t[:, o] = src[:, (o + d) mod HW]; wrapped lanes are zeroed by masks.
        if d == 0:
            return src
        return pltpu.roll(src, (roll_sign * -d) % HW, axis=1)

    def build_col(get_src):
        # im2col: write the 9 shifted/masked taps into the (9*C, B*HW) bf16
        # scratch (all stores are tile-aligned and full lane width).
        for b in range(B):
            src = get_src(b)                                     # (C, HW) f32
            for dh in range(3):
                for dw in range(3):
                    piece = shifted(src, (dh - 1) * W + (dw - 1))
                    if dh == 0:
                        piece = piece * m_top
                    elif dh == 2:
                        piece = piece * m_bot
                    if dw == 0:
                        piece = piece * m_lft
                    elif dw == 2:
                        piece = piece * m_rgt
                    t = 3 * dh + dw
                    col_ref[t * C:(t + 1) * C, b * HW:(b + 1) * HW] = (
                        piece.astype(jnp.bfloat16))

    def bn(y, k):                                   # folded eval-mode BatchNorm
        return y * scale_ref[k] + bias_ref[k]

    # ---- stem: conv3x3(3->C) + BN + ReLU as one K=32 matmul per image ------
    for b in range(B):
        a = jnp.dot(ws_ref[...], x_ref[b], preferred_element_type=jnp.float32)
        act_ref[:, b * HW:(b + 1) * HW] = jnp.maximum(bn(a, 0), 0.0)

    # ---- 3 fused BasicBlocks (64->64, stride 1, identity shortcut) ---------
    for blk in range(3):
        k1, k2 = 1 + 2 * blk, 2 + 2 * blk
        # conv1 + BN1 + ReLU
        build_col(lambda b: act_ref[:, b * HW:(b + 1) * HW])
        h = jnp.maximum(
            bn(jnp.dot(wb_ref[k1 - 1], col_ref[...],
                       preferred_element_type=jnp.float32), k1), 0.0)
        # conv2 + BN2 + residual + ReLU (h never leaves VMEM/vregs)
        build_col(lambda b: h[:, b * HW:(b + 1) * HW])
        y = jnp.maximum(
            bn(jnp.dot(wb_ref[k2 - 1], col_ref[...],
                       preferred_element_type=jnp.float32), k2) + act_ref[...],
            0.0)
        if blk < 2:
            act_ref[...] = y
        else:
            for b in range(B):
                o_ref[b] = y[:, b * HW:(b + 1) * HW]


# ----------------------------------------------------------------------------
# Wrapper: NCHW in -> NCHW out, one fused pallas_call over the batch.
# ----------------------------------------------------------------------------
def resnet34_extractor_forward(x_nchw, params, *, images_per_step=1):
    N, Cin, H, W = x_nchw.shape
    C = 64
    HW = H * W
    B = images_per_step
    assert N % B == 0, "batch must be divisible by images_per_step"
    assert HW % 128 == 0, "flattened spatial extent must be lane aligned"
    KS = 32
    assert 9 * Cin <= KS

    # Stem im2col in XLA (tiny 3-channel input), K padded 27 -> 32, channel-
    # major layout (K, H*W) so the kernel activations are lane dense.
    xp = jnp.pad(x_nchw, ((0, 0), (0, 0), (1, 1), (1, 1)))
    cols = [xp[:, :, dh:dh + H, dw:dw + W] for dh in range(3) for dw in range(3)]
    xcol = jnp.concatenate(cols, axis=1)                      # (N, 9*Cin, H, W)
    xcol = jnp.pad(xcol, ((0, 0), (0, KS - 9 * Cin), (0, 0), (0, 0)))
    xcol = xcol.reshape(N, KS, HW).astype(jnp.bfloat16)

    # Weights in transposed im2col layout (Cout, K), bf16.
    ws = params["layer0"]["w"].reshape(9 * Cin, C)
    ws = jnp.pad(ws, ((0, KS - 9 * Cin), (0, 0))).T.astype(jnp.bfloat16)   # (C, KS)
    wb = jnp.stack([params["blocks"][b][cb]["w"].reshape(9 * C, C).T
                    for b in range(3) for cb in ("cb1", "cb2")]
                   ).astype(jnp.bfloat16)                                  # (6, C, 9C)

    scs = [params["layer0"]["scale"]]
    bis = [params["layer0"]["bias"]]
    for b in range(3):
        for cb in ("cb1", "cb2"):
            scs.append(params["blocks"][b][cb]["scale"])
            bis.append(params["blocks"][b][cb]["bias"])
    scale = jnp.stack(scs).astype(jnp.float32)[:, :, None]                 # (7, C, 1)
    bias = jnp.stack(bis).astype(jnp.float32)[:, :, None]                  # (7, C, 1)

    kernel = functools.partial(_extractor_kernel, H=H, W=W, C=C, B=B,
                               roll_sign=_lane_roll_sign())
    out = pl.pallas_call(
        kernel,
        out_shape=jax.ShapeDtypeStruct((N, C, HW), jnp.float32),
        grid=(N // B,),
        in_specs=[
            pl.BlockSpec((B, KS, HW), lambda n: (n, 0, 0)),        # stem im2col
            pl.BlockSpec((C, KS), lambda n: (0, 0)),               # stem weight
            pl.BlockSpec((6, C, 9 * C), lambda n: (0, 0, 0)),      # block weights
            pl.BlockSpec((7, C, 1), lambda n: (0, 0, 0)),          # BN scales
            pl.BlockSpec((7, C, 1), lambda n: (0, 0, 0)),          # BN biases
        ],
        out_specs=pl.BlockSpec((B, C, HW), lambda n: (n, 0, 0)),
        scratch_shapes=[
            pltpu.VMEM((9 * C, B * HW), jnp.bfloat16),   # im2col matrix
            pltpu.VMEM((C, B * HW), jnp.float32),        # block input / residual
        ],
        compiler_params=pltpu.CompilerParams(
            dimension_semantics=("parallel",),
            vmem_limit_bytes=32 * 1024 * 1024),
    )(xcol, ws, wb, scale, bias)
    return out.reshape(N, C, H, W)                        # already NCHW


# ----------------------------------------------------------------------------
# Parameter construction (deterministic, synthetic) + BN folding.
# ----------------------------------------------------------------------------
def _fold_bn(gamma, beta, mean, var):
    scale = gamma / jnp.sqrt(var + EPS)
    bias = beta - mean * scale
    return scale, bias


def _make_conv_bn(key, cin, cout):
    kw, kg, kb, km, kv = jax.random.split(key, 5)
    w = jax.random.normal(kw, (3, 3, cin, cout), jnp.float32) * 0.05  # HWIO
    gamma = 1.0 + 0.1 * jax.random.normal(kg, (cout,), jnp.float32)
    beta = 0.1 * jax.random.normal(kb, (cout,), jnp.float32)
    mean = 0.1 * jax.random.normal(km, (cout,), jnp.float32)
    var = jax.random.uniform(kv, (cout,), jnp.float32, 0.5, 1.5)
    scale, bias = _fold_bn(gamma, beta, mean, var)
    return {"w": w, "scale": scale, "bias": bias}


def init_params(key):
    keys = jax.random.split(key, 7)
    params = {"layer0": _make_conv_bn(keys[0], 3, 64), "blocks": []}
    # layer1 = ResBlockLayer(BasicBlock, 64, 3, stride=1, in_planes=64)
    # -> three 64->64 stride-1 BasicBlocks with identity shortcuts.
    for b in range(3):
        params["blocks"].append({
            "cb1": _make_conv_bn(keys[1 + 2 * b], 64, 64),
            "cb2": _make_conv_bn(keys[2 + 2 * b], 64, 64),
        })
    return params


# ----------------------------------------------------------------------------
# Pure-JAX reference (same bf16-input / f32-accumulate convention).
# ----------------------------------------------------------------------------
def _ref_conv_bn(x, cb, residual=None, relu=True):
    y = jax.lax.conv_general_dilated(
        x.astype(jnp.bfloat16), cb["w"].astype(jnp.bfloat16),
        window_strides=(1, 1), padding="SAME",
        dimension_numbers=("NHWC", "HWIO", "NHWC"),
        preferred_element_type=jnp.float32)
    y = y * cb["scale"] + cb["bias"]
    if residual is not None:
        y = y + residual
    if relu:
        y = jnp.maximum(y, 0.0)
    return y


def reference_forward(x_nchw, params):
    x = jnp.transpose(x_nchw, (0, 2, 3, 1))
    x = _ref_conv_bn(x, params["layer0"])
    for p in params["blocks"]:
        h = _ref_conv_bn(x, p["cb1"])
        x = _ref_conv_bn(h, p["cb2"], residual=x)
    return jnp.transpose(x, (0, 3, 1, 2))


if __name__ == "__main__":
    key = jax.random.PRNGKey(0)
    kx, kp = jax.random.split(key)

    # NCHW RGB input, same convention as the PyTorch module.  Batch 4 so that
    # each v7x TensorCore gets >= 2 grid steps under megacore sharding.
    x = jax.random.normal(kx, (4, 3, 16, 16), jnp.float32)
    params = init_params(kp)

    _lane_roll_sign()  # probe the rotate convention once, outside jit

    fwd = jax.jit(resnet34_extractor_forward)
    out = jax.block_until_ready(fwd(x, params))
    assert out.shape == (4, 64, 16, 16), out.shape

    ref = jax.block_until_ready(reference_forward(x, params))
    max_err = float(jnp.max(jnp.abs(out - ref)))
    assert jnp.allclose(out, ref, atol=2e-3, rtol=2e-3), max_err

    print("KERNEL_OK")
</pallas_src>

<mosaic_0001>
module attributes {stable_mosaic.version = 11 : i64} {
  func.func @probe(%arg0: memref<8x128xf32, #tpu.memory_space<vmem>>, %arg1: memref<8x128xf32, #tpu.memory_space<vmem>>) attributes {dimension_semantics = [], scalar_prefetch = 0 : i64, scratch_operands = 0 : i64, tpu.core_type = #tpu.core_type<tc>} {
    %c0 = arith.constant 0 : index
    %c0_0 = arith.constant 0 : index
    %0 = vector.load %arg0[%c0, %c0_0] : memref<8x128xf32, #tpu.memory_space<vmem>>, vector<8x128xf32>
    %c1_i32 = arith.constant 1 : i32
    %1 = tpu.dynamic_rotate %0 by %c1_i32 dim 1 : vector<8x128xf32>, i32 -> vector<8x128xf32>
    %c0_1 = arith.constant 0 : index
    %c0_2 = arith.constant 0 : index
    %2 = vector.load %arg1[%c0_1, %c0_2] : memref<8x128xf32, #tpu.memory_space<vmem>>, vector<8x128xf32>
    tpu.vector_store %arg1[%c0_1, %c0_2], %1 {strides = array<i32>} : memref<8x128xf32, #tpu.memory_space<vmem>>, vector<8x128xf32>,
    return
  }
}

</mosaic_0001>

<bundles_post_ra>
// kernel: tpu_custom_call.1
= control target key start
LH: loop header
LB: loop body
LE: loop exit
PB: predicated region body
PF: predicated region fallthrough
CT: control target
= control target key end

     0   :  { %6 = vsyncpa [#allocation3], 0  ;;  %s128_s0 = inlined_call_operand.hbm [shape: f32[8,128], index: 0, kind: input, shape index: {}]   ;;  %s129_s1 = inlined_call_operand.hbm [shape: f32[8,128], index: 1, kind: output, shape index: {}]  }
   0x1   :  { %7 = vsyncpa [#allocation4], 0  ;;  %s91_s6 = smov [#allocation2]   ;;  %s43_s10 = scalar_lea.hbm %s128_s0, 128 }
   0x2   :  { %s14_s7 = sshll.u32 %s91_s6, 4  ;;  %p44_p0 = scmp.ne.s32.totalorder %s128_s0, %s43_s10  ;;  %s15_s7 = int_to_ptr.vmem [resolvable:$true] %s14_s7 }
   0x3   :  { %p47_p1 = scmp.lt.u32.totalorder %s43_s10, %s128_s0 }
   0x5   :  { %p49_p2 = pnand %p47_p1, %p44_p0 }
   0x7   :  { %52 = shalt.err (!%p49_p2)
}
   0x8   :  { %s53_s15 = scalar_lea.vmem %s15_s7, 128  ;;  %p58_p4 = scmp.lt.s32.totalorder %s15_s7, %s15_s7 }
   0x9   :  { %p54_p3 = scmp.ne.s32.totalorder %s15_s7, %s53_s15  ;;  %p59_p5 = scmp.lt.s32.totalorder %s53_s15, %s53_s15 }
   0xb   :  { %p60_p6 = por %p59_p5, %p58_p4 }
   0xd   :  { %p61_p7 = pnand %p60_p6, %p54_p3 }
   0xf   :  { %64 = shalt.err (!%p61_p7)
}
  0x10   :  { %17 = dma.hbm_to_vmem [thread:$0]  %s128_s0, 128, %s15_s7, [#allocation3]  }
  0x11   :  { %87 = dma.done.wait [#allocation3], 128  }
  0x12   :  { %88 = vsyncadd [#allocation3], 4294967168  ;;  %v21_v0 = vld [vmem:[#allocation2] sm:$0xff]  ;;  %s92_s18 = smov 1   ;;  %s93_s19 = smov [#allocation5]  }
  0x13   :  { %22 = vrot.lane.b32.xlu0 %v21_v0, %s92_s18  ;;  %s31_s20 = sshll.u32 %s93_s19, 4  ;;  %s32_s20 = int_to_ptr.vmem [resolvable:$true] %s31_s20 }
  0x14   :  { %s65_s21 = scalar_lea.vmem %s32_s20, 128  ;;  %p70_p9 = scmp.lt.s32.totalorder %s32_s20, %s32_s20 }
  0x15   :  { %p66_p8 = scmp.ne.s32.totalorder %s32_s20, %s65_s21  ;;  %p71_p10 = scmp.lt.s32.totalorder %s65_s21, %s65_s21 }
  0x17   :  { %p72_p11 = por %p71_p10, %p70_p9 }
  0x19   :  { %p73_p12 = pnand %p72_p11, %p66_p8 }
  0x85   :  { %v23_v1 = vpop.permute.xlu0 %22 }
  0x86   :  { %24 = vst [vmem:[#allocation5] sm:$0xff] %v23_v1 }
  0x87   :  { %76 = shalt.err (!%p73_p12)
}
  0x88   :  { %s77_s0 = scalar_lea.hbm %s129_s1, 128 }
  0x89   :  { %p78_p13 = scmp.ne.s32.totalorder %s129_s1, %s77_s0  ;;  %p81_p0 = scmp.lt.u32.totalorder %s77_s0, %s129_s1 }
  0x8b   :  { %p83_p1 = pnand %p81_p0, %p78_p13 }
  0x8d   :  { %86 = shalt.err (!%p83_p1)
}
  0x8e   :  { %34 = dma.vmem_to_hbm [thread:$0]  %s32_s20, 128, %s129_s1, [#allocation4]  }
  0x8f   :  { %89 = dma.done.wait [#allocation4], 128  }
  0x90   :  { %90 = vsyncadd [#allocation4], 4294967168 }
  0x91   :  { %38 = vsyncpa [#allocation3], 1 }
  0x92   :  { %39 = vsyncpa [#allocation4], 1 }

</bundles_post_ra>
